<compile_context>
chip_gen: v7x
topology: tpu7x:2x2x1
jax: 0.10.0
libtpu: 0.0.40
codegen_flags: <defaults>
</compile_context>

<pallas_src>
import jax
import jax.numpy as jnp
import numpy as np
from jax.experimental import pallas as pl
from jax.experimental.pallas import tpu as pltpu

IN_FEATURES = 66
OUT_FEATURES = 11
PADDED_OUT = 128          # lane-dense compute width for the softmax math
NEG_MASK = -1.0e30        # "minus infinity" for padded logit columns


def _round_up(n, m):
    return ((n + m - 1) // m) * m


def _choose_tb(B, *, tb_max=8192, min_steps=2):
    """Batch tile: multiple of 8, capped at tb_max, with >= min_steps grid steps
    (so the 'parallel' batch axis can shard across both v7x TensorCores) when B
    is large enough to allow it."""
    tb = min(tb_max, _round_up(max(B, 8), 8))
    if B >= 2 * 8 * min_steps:
        tb = min(tb, _round_up(pl.cdiv(B, min_steps), 8))
    return max(tb, 8)


def ensemble_kernel(x_ref, w_ref, b_ref, o_ref):
    # x_ref: (TB, 66), w_ref: (66, 128), b_ref: (1, 128), o_ref: (TB, 11)
    logits = (
        jnp.dot(x_ref[...], w_ref[...], preferred_element_type=jnp.float32)
        + b_ref[...]
    )
    # Numerically-stable softmax over the (padded) class axis.  Padded columns
    # carry logit ~ -1e30 -> exp underflows to exactly 0, so the denominator
    # only sums the 11 real classes.
    m = jnp.max(logits, axis=-1, keepdims=True)
    e = jnp.exp(logits - m)
    denom = jnp.sum(e, axis=-1, keepdims=True)
    probs = e * pl.reciprocal(denom, approx=False)
    # Compact store: only the 11 real class columns go back to HBM.
    o_ref[...] = probs[:, :OUT_FEATURES].astype(o_ref.dtype)


def ensemble_forward(x, w_pad, b_pad, *, tb=None):
    """x: (B, 66) f32, w_pad: (66, 128) f32, b_pad: (1, 128) f32 -> (B, 11) f32."""
    B = x.shape[0]
    if tb is None:
        tb = _choose_tb(B)
    grid = (pl.cdiv(B, tb),)   # ragged final block handled by Pallas masking

    out = pl.pallas_call(
        ensemble_kernel,
        out_shape=jax.ShapeDtypeStruct((B, OUT_FEATURES), jnp.float32),
        grid_spec=pltpu.PrefetchScalarGridSpec(
            num_scalar_prefetch=0,
            grid=grid,
            in_specs=[
                pl.BlockSpec((tb, IN_FEATURES), lambda i: (i, 0)),
                pl.BlockSpec((IN_FEATURES, PADDED_OUT), lambda i: (0, 0)),
                pl.BlockSpec((1, PADDED_OUT), lambda i: (0, 0)),
            ],
            out_specs=pl.BlockSpec((tb, OUT_FEATURES), lambda i: (i, 0)),
        ),
        compiler_params=pltpu.CompilerParams(
            dimension_semantics=("parallel",),
            vmem_limit_bytes=32 << 20,
        ),
    )(x, w_pad, b_pad)

    return out


def make_params():
    # Weight exactly as in the module: concat of six 11x11 identities -> (11, 66).
    w = np.concatenate([np.identity(OUT_FEATURES)] * 6, axis=1).astype(np.float32)
    w_t = w.T  # (66, 11), kernel computes x @ W.T

    # Bias: nn.Linear default init is U(-1/sqrt(fan_in), 1/sqrt(fan_in)); made
    # deterministic with a fixed JAX key (will not bit-match a torch init).
    bound = 1.0 / np.sqrt(IN_FEATURES)
    b = jax.random.uniform(
        jax.random.PRNGKey(42), (1, OUT_FEATURES), dtype=jnp.float32,
        minval=-bound, maxval=bound,
    )

    # Lane-dense padding: zero weight columns 11..127, "-inf" bias there.
    w_pad = np.zeros((IN_FEATURES, PADDED_OUT), dtype=np.float32)
    w_pad[:, :OUT_FEATURES] = w_t
    b_pad = np.full((1, PADDED_OUT), NEG_MASK, dtype=np.float32)
    b_pad[:, :OUT_FEATURES] = np.asarray(b)

    return jnp.asarray(w_t), jnp.asarray(b), jnp.asarray(w_pad), jnp.asarray(b_pad)


if __name__ == "__main__":
    key = jax.random.PRNGKey(0)
    w_t, b, w_pad, b_pad = make_params()

    # --- small single-block case ---
    B = 8
    x = jax.random.normal(key, (B, IN_FEATURES), dtype=jnp.float32)
    out = jax.block_until_ready(ensemble_forward(x, w_pad, b_pad))

    assert out.shape == (B, OUT_FEATURES)
    np.testing.assert_allclose(np.asarray(jnp.sum(out, axis=-1)), np.ones(B), rtol=1e-5)
    ref = jax.nn.softmax(x @ w_t + b, axis=-1)
    np.testing.assert_allclose(np.asarray(out), np.asarray(ref), rtol=1e-5, atol=1e-6)

    # --- multi-step grid + ragged final block (B not a multiple of the tile) ---
    B2 = 50
    x2 = jax.random.normal(jax.random.PRNGKey(1), (B2, IN_FEATURES), dtype=jnp.float32)
    out2 = jax.block_until_ready(ensemble_forward(x2, w_pad, b_pad, tb=16))

    assert out2.shape == (B2, OUT_FEATURES)
    ref2 = jax.nn.softmax(x2 @ w_t + b, axis=-1)
    np.testing.assert_allclose(np.asarray(out2), np.asarray(ref2), rtol=1e-5, atol=1e-6)

    # --- auto-tb path (exercises the >=2-step grid heuristic) ---
    B3 = 50
    out3 = jax.block_until_ready(ensemble_forward(x2, w_pad, b_pad))
    np.testing.assert_allclose(np.asarray(out3), np.asarray(ref2), rtol=1e-5, atol=1e-6)

    print("KERNEL_OK")
</pallas_src>

<mosaic_0001>
module attributes {stable_mosaic.version = 11 : i64} {
  func.func @ensemble_kernel(%arg0: i32, %arg1: memref<8x66xf32, #tpu.memory_space<vmem>>, %arg2: memref<66x128xf32, #tpu.memory_space<vmem>>, %arg3: memref<1x128xf32, #tpu.memory_space<vmem>>, %arg4: memref<8x11xf32, #tpu.memory_space<vmem>>) attributes {dimension_semantics = [#tpu.dimension_semantics<parallel>], iteration_bounds = array<i64: 1>, scalar_prefetch = 0 : i64, scratch_operands = 0 : i64, tpu.core_type = #tpu.core_type<tc>, window_params = [{transform_indices = @transform_0, window_bounds = array<i64: 8, 66>}, {pipeline_mode = #tpu.pipeline_mode<synchronous>, transform_indices = @transform_1, window_bounds = array<i64: 66, 128>}, {pipeline_mode = #tpu.pipeline_mode<synchronous>, transform_indices = @transform_2, window_bounds = array<i64: 1, 128>}, {transform_indices = @transform_3, window_bounds = array<i64: 8, 11>}]} {
    %c0 = arith.constant 0 : index
    %c0_0 = arith.constant 0 : index
    %0 = vector.load %arg1[%c0, %c0_0] : memref<8x66xf32, #tpu.memory_space<vmem>>, vector<8x66xf32>
    %c0_1 = arith.constant 0 : index
    %c0_2 = arith.constant 0 : index
    %1 = vector.load %arg2[%c0_1, %c0_2] : memref<66x128xf32, #tpu.memory_space<vmem>>, vector<66x128xf32>
    %cst = arith.constant dense<0.000000e+00> : vector<8x128xf32>
    %2 = tpu.matmul %0, %1, %cst {dimension_numbers = #tpu.dot_dimension_numbers<[1], [0], [0], [1], [0, 0, 1, 1], [], []>} : vector<8x66xf32>, vector<66x128xf32>, vector<8x128xf32> -> vector<8x128xf32>
    %c0_3 = arith.constant 0 : index
    %c0_4 = arith.constant 0 : index
    %3 = vector.load %arg3[%c0_3, %c0_4] : memref<1x128xf32, #tpu.memory_space<vmem>>, vector<1x128xf32>
    %4 = vector.broadcast %3 : vector<1x128xf32> to vector<8x128xf32>
    %5 = arith.addf %2, %4 : vector<8x128xf32>
    %cst_5 = arith.constant dense<0xFF800000> : vector<8xf32>
    %6 = vector.multi_reduction <maximumf>, %5, %cst_5 [1] : vector<8x128xf32> to vector<8xf32>
    %7 = vector.shape_cast %6 : vector<8xf32> to vector<8x1xf32>
    %8 = vector.broadcast %7 : vector<8x1xf32> to vector<8x128xf32>
    %9 = arith.subf %5, %8 : vector<8x128xf32>
    %10 = math.exp %9 : vector<8x128xf32>
    %cst_6 = arith.constant dense<0.000000e+00> : vector<8xf32>
    %11 = vector.multi_reduction <add>, %10, %cst_6 [1] : vector<8x128xf32> to vector<8xf32>
    %12 = vector.shape_cast %11 : vector<8xf32> to vector<8x1xf32>
    %13 = tpu.reciprocal %12 : vector<8x1xf32> -> vector<8x1xf32>
    %14 = vector.broadcast %13 : vector<8x1xf32> to vector<8x128xf32>
    %15 = arith.mulf %10, %14 : vector<8x128xf32>
    %16 = vector.extract_strided_slice %15 {offsets = [0, 0], sizes = [8, 11], strides = [1, 1]} : vector<8x128xf32> to vector<8x11xf32>
    %c0_7 = arith.constant 0 : index
    %c0_8 = arith.constant 0 : index
    %17 = vector.load %arg4[%c0_7, %c0_8] : memref<8x11xf32, #tpu.memory_space<vmem>>, vector<8x11xf32>
    tpu.vector_store %arg4[%c0_7, %c0_8], %16 {strides = array<i32>} : memref<8x11xf32, #tpu.memory_space<vmem>>, vector<8x11xf32>,
    return
  }
  func.func @transform_0(%arg0: i32) -> (i32, i32) {
    %c0_i32 = arith.constant 0 : i32
    %c0_i32_0 = arith.constant 0 : i32
    return %arg0, %c0_i32 : i32, i32
  }
  func.func @transform_1(%arg0: i32) -> (i32, i32) {
    %c0_i32 = arith.constant 0 : i32
    %c0_i32_0 = arith.constant 0 : i32
    %c0_i32_1 = arith.constant 0 : i32
    return %c0_i32, %c0_i32_0 : i32, i32
  }
  func.func @transform_2(%arg0: i32) -> (i32, i32) {
    %c0_i32 = arith.constant 0 : i32
    %c0_i32_0 = arith.constant 0 : i32
    %c0_i32_1 = arith.constant 0 : i32
    return %c0_i32, %c0_i32_0 : i32, i32
  }
  func.func @transform_3(%arg0: i32) -> (i32, i32) {
    %c0_i32 = arith.constant 0 : i32
    %c0_i32_0 = arith.constant 0 : i32
    return %arg0, %c0_i32 : i32, i32
  }
}

</mosaic_0001>

<bundles_post_ra>
// kernel: tpu_custom_call.1
= control target key start
LH: loop header
LB: loop body
LE: loop exit
PB: predicated region body
PF: predicated region fallthrough
CT: control target
= control target key end

     0   :  { %8 = vsyncpa [#allocation3], 0  ;;  %s367_s0 = inlined_call_operand.hbm [shape: f32[8,66], index: 0, kind: input, shape index: {}]   ;;  %s368_s1 = inlined_call_operand.hbm [shape: f32[66,128], index: 1, kind: input, shape index: {}]   ;;  %s369_s2 = inlined_call_operand.vmem [shape: f32[1,128], index: 2, kind: input, shape index: {}]   ;;  %s370_s3 = inlined_call_operand.hbm [shape: f32[8,11], index: 3, kind: output, shape index: {}]  }
   0x1   :  { %9 = vsyncpa [#allocation6], 0 }
   0x2   :  { %10 = vsyncpa [#allocation4], 0  ;;  %s293_s12 = smov [#allocation2]   ;;  %s294_s14 = smov [#allocation5]  }
   0x3   :  { %s17_s13 = sshll.u32 %s293_s12, 4  ;;  %s26_s15 = sshll.u32 %s294_s14, 4  ;;  %s18_s13 = int_to_ptr.vmem [resolvable:$true] %s17_s13  ;;  %s321_s15 = int_to_ptr.vmem [resolvable:$true] %s26_s15 }
   0x4   :  { %s221_s18 = scalar_lea.hbm %s367_s0, 128 }
   0x5   :  { %p222_p0 = scmp.ne.s32.totalorder %s367_s0, %s221_s18  ;;  %p225_p1 = scmp.lt.u32.totalorder %s221_s18, %s367_s0 }
   0x7   :  { %p227_p2 = pnand %p225_p1, %p222_p0 }
   0x9   :  { %230 = shalt.err (!%p227_p2)
}
   0xa   :  { %s231_s23 = scalar_lea.vmem %s18_s13, 128  ;;  %p236_p4 = scmp.lt.s32.totalorder %s18_s13, %s18_s13 }
   0xb   :  { %p232_p3 = scmp.ne.s32.totalorder %s18_s13, %s231_s23  ;;  %p237_p5 = scmp.lt.s32.totalorder %s231_s23, %s231_s23 }
   0xd   :  { %p238_p6 = por %p237_p5, %p236_p4 }
   0xf   :  { %p239_p7 = pnand %p238_p6, %p232_p3 }
  0x11   :  { %242 = shalt.err (!%p239_p7)
}
  0x12   :  { %20 = dma.hbm_to_vmem [thread:$0]  %s367_s0, 128, %s18_s13, [#allocation3]  }
  0x13   :  { %s243_s28 = scalar_lea.hbm %s368_s1, 1152 }
  0x14   :  { %p244_p8 = scmp.ne.s32.totalorder %s368_s1, %s243_s28  ;;  %p247_p9 = scmp.lt.u32.totalorder %s243_s28, %s368_s1 }
  0x16   :  { %p249_p10 = pnand %p247_p9, %p244_p8 }
  0x18   :  { %252 = shalt.err (!%p249_p10)
}
  0x19   :  { %s253_s6 = scalar_lea.vmem %s321_s15, 1152  ;;  %p258_p12 = scmp.lt.s32.totalorder %s321_s15, %s321_s15 }
  0x1a   :  { %p254_p11 = scmp.ne.s32.totalorder %s321_s15, %s253_s6  ;;  %p259_p13 = scmp.lt.s32.totalorder %s253_s6, %s253_s6 }
  0x1c   :  { %p260_p0 = por %p259_p13, %p258_p12 }
  0x1e   :  { %p261_p1 = pnand %p260_p0, %p254_p11 }
  0x20   :  { %264 = shalt.err (!%p261_p1)
}
  0x21   :  { %s295_s0 = smov 128   ;;  %s296_s7 = smov 8  }
  0x22   :  { %32 = dma.hbm_to_vmem [thread:$0]  %s368_s1, 1152, %s321_s15, [#allocation6], %s295_s0, %s295_s0, %s296_s7  }
  0x23   :  { %287 = dma.done.wait [#allocation3], 128  }
  0x24   :  { %288 = vsyncadd [#allocation3], 4294967168 }
  0x25   :  { %289 = dma.done.wait [#allocation6], 1152  }
  0x26   :  { %290 = vsyncadd [#allocation6], 4294966144  ;;  %v297_v0 = vmov 0.0|0.0   ;;  %vm298_vm0 = vmmov 0   ;;  %v299_v1 = vmov 0.0   ;;  %v42_v2 = vld [vmem:[#allocation5] sm:$0xff] }
  0x27   :  { %197 = vmatprep.subr.bf16.mxu0 %v297_v0  ;;  %194 = vmatprep.mubr.msk.f32.mxu0 %vm298_vm0, %v299_v1  ;;  %v43_v3 = vld [vmem:[#allocation5 + $0x8] sm:$0xff]  ;;  %v44_v4 = vld [vmem:[#allocation5 + $0x10] sm:$0xff]  ;;  %v45_v6 = vld [vmem:[#allocation5 + $0x18] sm:$0xff]  ;;  %vm62_vm1 = vcmask 1041408   ;;  %vm58_vm2 = vcmask 539648   ;;  %s300_s11 = smov [#allocation7]  }
  0x28   :  { %v198_v5 = vpack.c.bf16 %v43_v3, %v42_v2  ;;  %v201_v7 = vpack.c.bf16 %v45_v6, %v44_v4  ;;  %v46_v8 = vld [vmem:[#allocation5 + $0x20] sm:$0xff]  ;;  %v47_v9 = vld [vmem:[#allocation5 + $0x28] sm:$0xff]  ;;  %v48_v11 = vld [vmem:[#allocation5 + $0x30] sm:$0xff]  ;;  %s153_s12 = sshll.u32 %s300_s11, 4  ;;  %vm145_vm3 = vcmask 89088   ;;  %s154_s12 = int_to_ptr.vmem [resolvable:$true] %s153_s12 }
  0x29   :  { %v204_v10 = vpack.c.bf16 %v47_v9, %v46_v8  ;;  %v49_v12 = vld [vmem:[#allocation5 + $0x38] sm:$0xff]  ;;  %v50_v14 = vld [vmem:[#allocation5 + $0x40] sm:$0x3]  ;;  %p270_p3 = scmp.lt.s32.totalorder %s154_s12, %s154_s12 }
  0x2a   :  { %199 = vmatpush3.bf16.msra.mxu0 %v198_v5  ;;  %v207_v13 = vpack.c.bf16 %v49_v12, %v48_v11  ;;  %v41_v15 = vld [vmem:[#allocation2] sm:$0xff] }
  0x2b   :  { %200 = vmatprep.subr.bf16.mxu0 %v297_v0  ;;  %v163_v16 = vld [vmem:[%s369_s2] ss:$0 sm:$0xff]  ;;  %s265_s2 = scalar_lea.vmem %s154_s12, 128 }
  0x2c   :  { %p266_p2 = scmp.ne.s32.totalorder %s154_s12, %s265_s2  ;;  %p271_p4 = scmp.lt.s32.totalorder %s265_s2, %s265_s2 }
  0x2e   :  { %202 = vmatpush3.bf16.msra.mxu0 %v201_v7  ;;  %p272_p5 = por %p271_p4, %p270_p3 }
  0x2f   :  { %203 = vmatprep.subr.bf16.mxu0 %v297_v0 }
  0x30   :  { %p273_p6 = pnand %p272_p5, %p266_p2 }
  0x32   :  { %205 = vmatpush3.bf16.msra.mxu0 %v204_v10 }
  0x33   :  { %206 = vmatprep.subr.bf16.mxu0 %v297_v0 }
  0x36   :  { %208 = vmatpush3.bf16.msra.mxu0 %v207_v13 }
  0x37   :  { %192 = vmatprep.subr.mxu0 %v299_v1 }
  0x3a   :  { %193 = vmatpush3.msk.msra.mxu0 %vm62_vm1, %v50_v14 }
  0x3b   :  { %195 = vmatmul.mubr.msk.f32.vlgmr.msra.gmra.mrb[0].mxu0 %vm58_vm2, %v41_v15 }
 0x10e   :  { %v132_v17 = vpop.f32.mrb[0].mxu0 }
 0x10f   :  { %v133_v18 = vadd.f32 %v163_v16, %v132_v17  ;;  %v196_v19 = vpop.f32.mrb[1].mxu0 }
 0x111   :  { %136 = vmax.xlane.f32.xlu0 %v133_v18 }
 0x19e   :  { %v137_v20 = vpop.xlane.xlu0 %136 }
 0x19f   :  { %v138_v21 = vsub.f32 %v133_v18, %v137_v20 }
 0x1a1   :  { %v139_v22 = vmul.f32 1.442695, %v138_v21 }
 0x1a3   :  { %217 = vpow2.f32 %v139_v22 }
 0x1ad   :  { %v218_v23 = vpop.eup %217 }
 0x1ae   :  { %141 = vadd.xlane.f32.xlu0 %v218_v23 }
 0x23b   :  { %v142_v24 = vpop.xlane.xlu0 %141 }
 0x23c   :  { %219 = vrcp.f32 %v142_v24 }
 0x246   :  { %v220_v25 = vpop.eup %219 }
 0x247   :  { %v144_v26 = vmul.f32 %v220_v25, %v218_v23 }
 0x249   :  { %146 = vst.msk [vmem:[#allocation7] sm:$0xff] %vm145_vm3, %v144_v26 }
 0x24a   :  { %276 = shalt.err (!%p273_p6)
}
 0x24b   :  { %s277_s15 = scalar_lea.hbm %s370_s3, 128 }
 0x24c   :  { %p278_p7 = scmp.ne.s32.totalorder %s370_s3, %s277_s15  ;;  %p281_p8 = scmp.lt.u32.totalorder %s277_s15, %s370_s3 }
 0x24e   :  { %p283_p9 = pnand %p281_p8, %p278_p7 }
 0x250   :  { %286 = shalt.err (!%p283_p9)
}
 0x251   :  { %156 = dma.vmem_to_hbm [thread:$0]  %s154_s12, 128, %s370_s3, [#allocation4]  }
 0x252   :  { %291 = dma.done.wait [#allocation4], 128  }
 0x253   :  { %292 = vsyncadd [#allocation4], 4294967168 }
 0x254   :  { %160 = vsyncpa [#allocation3], 1 }
 0x255   :  { %161 = vsyncpa [#allocation6], 1 }
 0x256   :  { %162 = vsyncpa [#allocation4], 1 }

</bundles_post_ra>
